<compile_context>
chip_gen: v5e
topology: v5e:2x2
jax: 0.10.0
libtpu: 0.0.40
codegen_flags: <defaults>
</compile_context>

<pallas_src>
import functools

import jax
import jax.numpy as jnp
from jax.experimental import pallas as pl
from jax.experimental.pallas import tpu as pltpu


def _round_up(x, m):
    return ((x + m - 1) // m) * m


def exclusive_net_kernel(x_ref, w1_ref, b1_ref, w2_ref, b2_ref, w3_ref, b3_ref,
                         out_ref, *, inv_t):
    # fc1 + ReLU (MXU f32, f32 accumulation)
    h = jnp.dot(x_ref[...].astype(jnp.float32), w1_ref[...],
                preferred_element_type=jnp.float32) + b1_ref[...]
    h = jnp.maximum(h, 0.0)

    # fc2 + ReLU
    h = jnp.dot(h, w2_ref[...], preferred_element_type=jnp.float32) + b2_ref[...]
    h = jnp.maximum(h, 0.0)

    # fc3, then temperature scaling (inv_t is a compile-time constant).
    logits = (jnp.dot(h, w3_ref[...], preferred_element_type=jnp.float32)
              + b3_ref[...]) * inv_t

    # Numerically-stable softmax over the true last dim (no lane padding).
    m = jnp.max(logits, axis=-1, keepdims=True)
    e = jnp.exp(logits - m)
    denom = jnp.sum(e, axis=-1, keepdims=True)
    out_ref[...] = (e / denom).astype(out_ref.dtype)


def exclusive_net_forward(x, params, T=0.06, *, tile_b=2048, out_dtype=None,
                          vmem_limit_bytes=32 * 1024 * 1024):
    """x: [B, input_dim]. params: dict of w1,b1,w2,b2,w3,b3 ([in,out] weights)."""
    B, input_dim = x.shape
    hidden_dim = params["w1"].shape[1]
    output_dim = params["w3"].shape[1]
    if out_dtype is None:
        out_dtype = x.dtype

    # Batch tile: multiple of 8 sublanes, at most the (rounded-up) batch.
    row_align = 8
    eff_tile = min(max(int(tile_b), row_align), _round_up(B, row_align))
    eff_tile = _round_up(eff_tile, row_align)
    # v7x megacore: if a large batch would otherwise be a single grid step,
    # split it in two so both TensorCores get work (no-op on v5e/v6e).
    if B >= 256 and eff_tile >= _round_up(B, row_align):
        eff_tile = _round_up((B + 1) // 2, row_align)
    grid = (pl.cdiv(B, eff_tile),)

    # Host-side prep: tiny weights/biases in f32, biases as [1, out] rows.
    f32 = jnp.float32
    w1 = params["w1"].astype(f32)
    w2 = params["w2"].astype(f32)
    w3 = params["w3"].astype(f32)
    b1 = params["b1"].astype(f32).reshape(1, hidden_dim)
    b2 = params["b2"].astype(f32).reshape(1, hidden_dim)
    b3 = params["b3"].astype(f32).reshape(1, output_dim)

    kernel = functools.partial(exclusive_net_kernel, inv_t=float(1.0 / T))

    out = pl.pallas_call(
        kernel,
        out_shape=jax.ShapeDtypeStruct((B, output_dim), out_dtype),
        grid=grid,
        in_specs=[
            pl.BlockSpec((eff_tile, input_dim), lambda i: (i, 0)),   # x tile (streamed)
            pl.BlockSpec((input_dim, hidden_dim), lambda i: (0, 0)),  # w1 (resident)
            pl.BlockSpec((1, hidden_dim), lambda i: (0, 0)),          # b1
            pl.BlockSpec((hidden_dim, hidden_dim), lambda i: (0, 0)), # w2
            pl.BlockSpec((1, hidden_dim), lambda i: (0, 0)),          # b2
            pl.BlockSpec((hidden_dim, output_dim), lambda i: (0, 0)), # w3
            pl.BlockSpec((1, output_dim), lambda i: (0, 0)),          # b3
        ],
        out_specs=pl.BlockSpec((eff_tile, output_dim), lambda i: (i, 0)),
        compiler_params=pltpu.CompilerParams(
            dimension_semantics=("parallel",),
            vmem_limit_bytes=vmem_limit_bytes),
    )(x, w1, b1, w2, b2, w3, b3)
    return out


def init_params(key, input_dim, hidden_dim, output_dim):
    """Deterministic init mimicking nn.Linear's U(-1/sqrt(fan_in), 1/sqrt(fan_in))."""
    ks = jax.random.split(key, 6)

    def linear(kw, kb, fan_in, fan_out):
        bound = 1.0 / jnp.sqrt(jnp.float32(fan_in))
        w = jax.random.uniform(kw, (fan_in, fan_out), jnp.float32, -bound, bound)
        b = jax.random.uniform(kb, (fan_out,), jnp.float32, -bound, bound)
        return w, b

    w1, b1 = linear(ks[0], ks[1], input_dim, hidden_dim)
    w2, b2 = linear(ks[2], ks[3], hidden_dim, hidden_dim)
    w3, b3 = linear(ks[4], ks[5], hidden_dim, output_dim)
    return {"w1": w1, "b1": b1, "w2": w2, "b2": b2, "w3": w3, "b3": b3}


def reference_forward(x, params, T=0.06):
    h = jnp.maximum(x @ params["w1"] + params["b1"], 0.0)
    h = jnp.maximum(h @ params["w2"] + params["b2"], 0.0)
    logits = h @ params["w3"] + params["b3"]
    return jax.nn.softmax(logits / T, axis=-1)


if __name__ == "__main__":
    # Make the pure-JAX reference use full-precision matmuls; otherwise the TPU
    # default (low-precision) matmul error is amplified by the 1/T=16.7 scale
    # and the sharp softmax, and the comparison becomes meaningless.
    jax.config.update("jax_default_matmul_precision", "highest")

    key = jax.random.PRNGKey(0)
    k_params, k_x1, k_x2 = jax.random.split(key, 3)

    input_dim, hidden_dim, output_dim = 16, 32, 8
    params = init_params(k_params, input_dim, hidden_dim, output_dim)

    # 1) Small shape consistent with the module (single grid step).
    x_small = jax.random.normal(k_x1, (8, input_dim), jnp.float32)
    out_small = jax.block_until_ready(exclusive_net_forward(x_small, params, T=0.06))
    ref_small = reference_forward(x_small, params, T=0.06)
    assert out_small.shape == (8, output_dim)
    assert jnp.allclose(out_small, ref_small, atol=2e-3, rtol=2e-3), "small-batch mismatch"
    assert jnp.allclose(jnp.sum(out_small, axis=-1), 1.0, atol=1e-3), "rows must sum to 1"

    # 2) Multi-step grid with a ragged batch (exercises tiling + OOB masking).
    x_big = jax.random.normal(k_x2, (1000, input_dim), jnp.float32)
    ref_big = reference_forward(x_big, params, T=0.06)
    out_big = jax.block_until_ready(
        exclusive_net_forward(x_big, params, T=0.06, tile_b=256))
    assert out_big.shape == (1000, output_dim)
    assert jnp.allclose(out_big, ref_big, atol=2e-3, rtol=2e-3), "tiled-batch mismatch"
    assert jnp.allclose(jnp.sum(out_big, axis=-1), 1.0, atol=1e-3), "rows must sum to 1"

    # 3) Default large-tile path (batch split into 2 grid steps for v7x megacore).
    out_def = jax.block_until_ready(exclusive_net_forward(x_big, params, T=0.06))
    assert jnp.allclose(out_def, ref_big, atol=2e-3, rtol=2e-3), "large-tile mismatch"

    # 4) bf16 output writeback (halves output HBM traffic); looser checks.
    out_bf16 = jax.block_until_ready(
        exclusive_net_forward(x_big, params, T=0.06, out_dtype=jnp.bfloat16))
    out_bf16_f32 = out_bf16.astype(jnp.float32)
    assert out_bf16.shape == (1000, output_dim)
    assert bool(jnp.all(jnp.isfinite(out_bf16_f32)))
    assert jnp.allclose(jnp.sum(out_bf16_f32, axis=-1), 1.0, atol=2e-2)
    assert jnp.allclose(out_bf16_f32, ref_big, atol=2e-2), "bf16-output mismatch"

    print("KERNEL_OK")
</pallas_src>

<mosaic_0001>
module attributes {stable_mosaic.version = 11 : i64} {
  func.func @exclusive_net_kernel(%arg0: i32, %arg1: memref<8x16xf32, #tpu.memory_space<vmem>>, %arg2: memref<16x32xf32, #tpu.memory_space<vmem>>, %arg3: memref<1x32xf32, #tpu.memory_space<vmem>>, %arg4: memref<32x32xf32, #tpu.memory_space<vmem>>, %arg5: memref<1x32xf32, #tpu.memory_space<vmem>>, %arg6: memref<32x8xf32, #tpu.memory_space<vmem>>, %arg7: memref<1x8xf32, #tpu.memory_space<vmem>>, %arg8: memref<8x8xf32, #tpu.memory_space<vmem>>) attributes {dimension_semantics = [#tpu.dimension_semantics<parallel>], iteration_bounds = array<i64: 1>, scalar_prefetch = 0 : i64, scratch_operands = 0 : i64, tpu.core_type = #tpu.core_type<tc>, window_params = [{transform_indices = @transform_0, window_bounds = array<i64: 8, 16>}, {pipeline_mode = #tpu.pipeline_mode<synchronous>, transform_indices = @transform_1, window_bounds = array<i64: 16, 32>}, {pipeline_mode = #tpu.pipeline_mode<synchronous>, transform_indices = @transform_2, window_bounds = array<i64: 1, 32>}, {pipeline_mode = #tpu.pipeline_mode<synchronous>, transform_indices = @transform_3, window_bounds = array<i64: 32, 32>}, {pipeline_mode = #tpu.pipeline_mode<synchronous>, transform_indices = @transform_4, window_bounds = array<i64: 1, 32>}, {pipeline_mode = #tpu.pipeline_mode<synchronous>, transform_indices = @transform_5, window_bounds = array<i64: 32, 8>}, {pipeline_mode = #tpu.pipeline_mode<synchronous>, transform_indices = @transform_6, window_bounds = array<i64: 1, 8>}, {transform_indices = @transform_7, window_bounds = array<i64: 8, 8>}]} {
    %c0 = arith.constant 0 : index
    %c0_0 = arith.constant 0 : index
    %0 = vector.load %arg1[%c0, %c0_0] : memref<8x16xf32, #tpu.memory_space<vmem>>, vector<8x16xf32>
    %c0_1 = arith.constant 0 : index
    %c0_2 = arith.constant 0 : index
    %1 = vector.load %arg2[%c0_1, %c0_2] : memref<16x32xf32, #tpu.memory_space<vmem>>, vector<16x32xf32>
    %cst = arith.constant dense<0.000000e+00> : vector<8x32xf32>
    %2 = tpu.matmul %0, %1, %cst {dimension_numbers = #tpu.dot_dimension_numbers<[1], [0], [0], [1], [0, 0, 1, 1], [], []>, precision = #tpu.contract_precision<fp32>} : vector<8x16xf32>, vector<16x32xf32>, vector<8x32xf32> -> vector<8x32xf32>
    %c0_3 = arith.constant 0 : index
    %c0_4 = arith.constant 0 : index
    %3 = vector.load %arg3[%c0_3, %c0_4] : memref<1x32xf32, #tpu.memory_space<vmem>>, vector<1x32xf32>
    %4 = vector.broadcast %3 : vector<1x32xf32> to vector<8x32xf32>
    %5 = arith.addf %2, %4 : vector<8x32xf32>
    %cst_5 = arith.constant 0.000000e+00 : f32
    %6 = vector.broadcast %cst_5 : f32 to vector<8x32xf32>
    %7 = arith.maximumf %5, %6 : vector<8x32xf32>
    %c0_6 = arith.constant 0 : index
    %c0_7 = arith.constant 0 : index
    %8 = vector.load %arg4[%c0_6, %c0_7] : memref<32x32xf32, #tpu.memory_space<vmem>>, vector<32x32xf32>
    %cst_8 = arith.constant dense<0.000000e+00> : vector<8x32xf32>
    %9 = tpu.matmul %7, %8, %cst_8 {dimension_numbers = #tpu.dot_dimension_numbers<[1], [0], [0], [1], [0, 0, 1, 1], [], []>, precision = #tpu.contract_precision<fp32>} : vector<8x32xf32>, vector<32x32xf32>, vector<8x32xf32> -> vector<8x32xf32>
    %c0_9 = arith.constant 0 : index
    %c0_10 = arith.constant 0 : index
    %10 = vector.load %arg5[%c0_9, %c0_10] : memref<1x32xf32, #tpu.memory_space<vmem>>, vector<1x32xf32>
    %11 = vector.broadcast %10 : vector<1x32xf32> to vector<8x32xf32>
    %12 = arith.addf %9, %11 : vector<8x32xf32>
    %cst_11 = arith.constant 0.000000e+00 : f32
    %13 = vector.broadcast %cst_11 : f32 to vector<8x32xf32>
    %14 = arith.maximumf %12, %13 : vector<8x32xf32>
    %c0_12 = arith.constant 0 : index
    %c0_13 = arith.constant 0 : index
    %15 = vector.load %arg6[%c0_12, %c0_13] : memref<32x8xf32, #tpu.memory_space<vmem>>, vector<32x8xf32>
    %cst_14 = arith.constant dense<0.000000e+00> : vector<8x8xf32>
    %16 = tpu.matmul %14, %15, %cst_14 {dimension_numbers = #tpu.dot_dimension_numbers<[1], [0], [0], [1], [0, 0, 1, 1], [], []>, precision = #tpu.contract_precision<fp32>} : vector<8x32xf32>, vector<32x8xf32>, vector<8x8xf32> -> vector<8x8xf32>
    %c0_15 = arith.constant 0 : index
    %c0_16 = arith.constant 0 : index
    %17 = vector.load %arg7[%c0_15, %c0_16] : memref<1x8xf32, #tpu.memory_space<vmem>>, vector<1x8xf32>
    %18 = vector.broadcast %17 : vector<1x8xf32> to vector<8x8xf32>
    %19 = arith.addf %16, %18 : vector<8x8xf32>
    %cst_17 = arith.constant 16.666666 : f32
    %20 = vector.broadcast %cst_17 : f32 to vector<8x8xf32>
    %21 = arith.mulf %19, %20 : vector<8x8xf32>
    %cst_18 = arith.constant dense<0xFF800000> : vector<8xf32>
    %22 = vector.multi_reduction <maximumf>, %21, %cst_18 [1] : vector<8x8xf32> to vector<8xf32>
    %23 = vector.shape_cast %22 : vector<8xf32> to vector<8x1xf32>
    %24 = vector.broadcast %23 : vector<8x1xf32> to vector<8x8xf32>
    %25 = arith.subf %21, %24 : vector<8x8xf32>
    %26 = math.exp %25 : vector<8x8xf32>
    %cst_19 = arith.constant dense<0.000000e+00> : vector<8xf32>
    %27 = vector.multi_reduction <add>, %26, %cst_19 [1] : vector<8x8xf32> to vector<8xf32>
    %28 = vector.shape_cast %27 : vector<8xf32> to vector<8x1xf32>
    %29 = vector.broadcast %28 : vector<8x1xf32> to vector<8x8xf32>
    %30 = arith.divf %26, %29 : vector<8x8xf32>
    %c0_20 = arith.constant 0 : index
    %c0_21 = arith.constant 0 : index
    %31 = vector.load %arg8[%c0_20, %c0_21] : memref<8x8xf32, #tpu.memory_space<vmem>>, vector<8x8xf32>
    tpu.vector_store %arg8[%c0_20, %c0_21], %30 {strides = array<i32>} : memref<8x8xf32, #tpu.memory_space<vmem>>, vector<8x8xf32>,
    return
  }
  func.func @transform_0(%arg0: i32) -> (i32, i32) {
    %c0_i32 = arith.constant 0 : i32
    %c0_i32_0 = arith.constant 0 : i32
    return %arg0, %c0_i32 : i32, i32
  }
  func.func @transform_1(%arg0: i32) -> (i32, i32) {
    %c0_i32 = arith.constant 0 : i32
    %c0_i32_0 = arith.constant 0 : i32
    %c0_i32_1 = arith.constant 0 : i32
    return %c0_i32, %c0_i32_0 : i32, i32
  }
  func.func @transform_2(%arg0: i32) -> (i32, i32) {
    %c0_i32 = arith.constant 0 : i32
    %c0_i32_0 = arith.constant 0 : i32
    %c0_i32_1 = arith.constant 0 : i32
    return %c0_i32, %c0_i32_0 : i32, i32
  }
  func.func @transform_3(%arg0: i32) -> (i32, i32) {
    %c0_i32 = arith.constant 0 : i32
    %c0_i32_0 = arith.constant 0 : i32
    %c0_i32_1 = arith.constant 0 : i32
    return %c0_i32, %c0_i32_0 : i32, i32
  }
  func.func @transform_4(%arg0: i32) -> (i32, i32) {
    %c0_i32 = arith.constant 0 : i32
    %c0_i32_0 = arith.constant 0 : i32
    %c0_i32_1 = arith.constant 0 : i32
    return %c0_i32, %c0_i32_0 : i32, i32
  }
  func.func @transform_5(%arg0: i32) -> (i32, i32) {
    %c0_i32 = arith.constant 0 : i32
    %c0_i32_0 = arith.constant 0 : i32
    %c0_i32_1 = arith.constant 0 : i32
    return %c0_i32, %c0_i32_0 : i32, i32
  }
  func.func @transform_6(%arg0: i32) -> (i32, i32) {
    %c0_i32 = arith.constant 0 : i32
    %c0_i32_0 = arith.constant 0 : i32
    %c0_i32_1 = arith.constant 0 : i32
    return %c0_i32, %c0_i32_0 : i32, i32
  }
  func.func @transform_7(%arg0: i32) -> (i32, i32) {
    %c0_i32 = arith.constant 0 : i32
    %c0_i32_0 = arith.constant 0 : i32
    return %arg0, %c0_i32 : i32, i32
  }
}

</mosaic_0001>

<bundles_post_ra>
// kernel: tpu_custom_call.1
= control target key start
LH: loop header
LB: loop body
LE: loop exit
PB: predicated region body
PF: predicated region fallthrough
CT: control target
= control target key end

     0   :  { %12 = vsyncpa [#allocation3], 0  ;;  %s806_s0 = inlined_call_operand.vmem [shape: f32[8,16], index: 0, kind: input, shape index: {}]   ;;  %s807_s1 = inlined_call_operand.hbm [shape: f32[16,32], index: 1, kind: input, shape index: {}]   ;;  %s808_s2 = inlined_call_operand.vmem [shape: f32[1,32], index: 2, kind: input, shape index: {}]   ;;  %s809_s3 = inlined_call_operand.vmem [shape: f32[32,32], index: 3, kind: input, shape index: {}]   ;;  %s810_s4 = inlined_call_operand.vmem [shape: f32[1,32], index: 4, kind: input, shape index: {}]   ;;  %s811_s5 = inlined_call_operand.vmem [shape: f32[32,8], index: 5, kind: input, shape index: {}]   ;;  %s812_s6 = inlined_call_operand.vmem [shape: f32[1,8], index: 6, kind: input, shape index: {}]   ;;  %s813_s7 = inlined_call_operand.hbm [shape: f32[8,8], index: 7, kind: output, shape index: {}]  }
   0x1   :  { %13 = vsyncpa [#allocation4], 0  ;;  %s20_s26 = sshll.u32 %s807_s1, 4  ;;  %s715_s27 = smov [#allocation2]   ;;  %s21_s26 = int_to_ptr.hbm [resolvable:$true] %s20_s26 }
   0x2   :  { %s22_s28 = sshll.u32 %s715_s27, 4  ;;  %s716_s29 = smov 128   ;;  %s23_s28 = int_to_ptr.vmem [resolvable:$true] %s22_s28 }
   0x3   :  { %s717_s30 = smov 8  }
   0x4   :  { %28 = dma.hbm_to_vmem [thread:$0]  %s21_s26, 256, %s23_s28, [#allocation3], %s716_s29, %s716_s29, %s717_s30  }
   0x5   :  { %711 = dma.done.wait [#allocation3], 256  }
   0x6   :  { %712 = vsyncadd [#allocation3], 4294967040  ;;  %vm50_vm0 = vcmask 130048   ;;  %v45_v0 = vld [vmem:[#allocation2 + $0x8] sm:$0xff]  ;;  %v44_v1 = vld [vmem:[#allocation2] sm:$0xff]  ;;  %vm222_vm1 = vcmask 261120  }
   0x7   :  { %v43_v2 = vld [vmem:[%s806_s0] sm:$0xff]  ;;  %v68_v3 = vand.u32 4294901760, %v45_v0  ;;  %v70_v4 = vand.u32 4294901760, %v44_v1  ;;  %v217_v19 = vld [vmem:[%s809_s3 + $0x18] sm:$0xff]  ;;  %v216_v21 = vld [vmem:[%s809_s3 + $0x10] sm:$0xff]  ;;  %vm609_vm2 = vcmask 64512  }
   0x8   :  { %v52_v5 = vsel %vm50_vm0, %v43_v2, 0  ;;  %v238_v20 = vand.u32 4294901760, %v217_v19  ;;  %v240_v23 = vand.u32 4294901760, %v216_v21  ;;  %v215_v24 = vld [vmem:[%s809_s3 + $0x8] sm:$0xff]  ;;  %v214_v28 = vld [vmem:[%s809_s3] sm:$0xff]  ;;  %v415_v63 = vld [vmem:[%s811_s5 + $0x18] sm:$0xff] }
   0x9   :  { %v72_v6 = vand.u32 4294901760, %v52_v5  ;;  %v96_v7 = vsub.f32 %v45_v0, %v68_v3  ;;  %69 = vmatpush.msra.mxu0 %v68_v3  ;;  %v102_v8 = vsub.f32 %v44_v1, %v70_v4  ;;  %153 = vmatpush.msra.mxu3 %v68_v3  ;;  %v242_v27 = vand.u32 4294901760, %v215_v24  ;;  %v656_v43 = vld [vmem:[%s808_s2] ss:$0 sm:$0xff]  ;;  %v414_v1 = vld [vmem:[%s811_s5 + $0x10] sm:$0xff]  ;;  %s642_s29 = sshll.u32 %s813_s7, 4  ;;  %s643_s29 = int_to_ptr.hbm [resolvable:$true] %s642_s29 }
   0xa   :  { %v268_v22 = vsub.f32 %v217_v19, %v238_v20  ;;  %v274_v26 = vsub.f32 %v216_v21, %v240_v23  ;;  %v244_v32 = vand.u32 4294901760, %v214_v28  ;;  %v435_v0 = vand.u32 4294901760, %v415_v63 }
   0xb   :  { %v73_v9 = vsub.f32 %v52_v5, %v72_v6  ;;  %128 = vmatpush.msra.mxu2 %v96_v7  ;;  %71 = vmatpush.msra.mxu0 %v70_v4  ;;  %v97_v10 = vand.u32 4294901760, %v96_v7  ;;  %v103_v11 = vand.u32 4294901760, %v102_v8  ;;  %v280_v31 = vsub.f32 %v215_v24, %v242_v27 }
   0xc   :  { %155 = vmatpush.msra.mxu3 %v70_v4  ;;  %v269_v25 = vand.u32 4294901760, %v268_v22  ;;  %v275_v30 = vand.u32 4294901760, %v274_v26  ;;  %v286_v36 = vsub.f32 %v214_v28, %v244_v32  ;;  %v465_v2 = vsub.f32 %v415_v63, %v435_v0 }
   0xd   :  { %v74_v12 = vand.u32 4294901760, %v73_v9  ;;  %131 = vmatpush.msra.mxu2 %v102_v8  ;;  %v98_v13 = vsub.f32 %v96_v7, %v97_v10  ;;  %180 = vmatpush.msrb.mxu0 %v97_v10  ;;  %v104_v14 = vsub.f32 %v102_v8, %v103_v11  ;;  %v281_v35 = vand.u32 4294901760, %v280_v31  ;;  %v412_v8 = vld [vmem:[%s811_s5] sm:$0xff] }
   0xe   :  { %134 = vmatmul.f32.vlgmr.msra.gmra.mxu2 %v73_v9  ;;  %v270_v29 = vsub.f32 %v268_v22, %v269_v25  ;;  %v276_v34 = vsub.f32 %v274_v26, %v275_v30  ;;  %v287_v39 = vand.u32 4294901760, %v286_v36  ;;  %v466_v5 = vand.u32 4294901760, %v465_v2 }
   0xf   :  { %v75_v15 = vsub.f32 %v73_v9, %v74_v12  ;;  %159 = vmatmul.f32.vlgmr.msra.gmra.mxu3 %v74_v12  ;;  %v99_v16 = vand.u32 4294901760, %v98_v13  ;;  %v105_v17 = vand.u32 4294901760, %v104_v14  ;;  %184 = vmatpush.msrb.mxu0 %v103_v11  ;;  %v282_v38 = vsub.f32 %v280_v31, %v281_v35 }
  0x10   :  { %239 = vmatpush.msrb.mxu2 %v238_v20  ;;  %v271_v33 = vand.u32 4294901760, %v270_v29  ;;  %v277_v37 = vand.u32 4294901760, %v276_v34  ;;  %v288_v41 = vsub.f32 %v286_v36, %v287_v39  ;;  %v467_v9 = vsub.f32 %v465_v2, %v466_v5 }
  0x11   :  { %v76_v18 = vand.u32 4294901760, %v75_v15  ;;  %100 = vmatpush.msra.mxu1 %v99_v16  ;;  %v283_v40 = vand.u32 4294901760, %v282_v38  ;;  %v441_v12 = vand.u32 4294901760, %v412_v8 }
  0x12   :  { %241 = vmatpush.msrb.mxu2 %v240_v23  ;;  %272 = vmatpush.msrb.mxu3 %v271_v33  ;;  %v289_v42 = vand.u32 4294901760, %v288_v41  ;;  %v468_v13 = vand.u32 4294901760, %v467_v9 }
  0x13   :  { %77 = vmatmul.f32.vlgmr.msra.gmra.mxu0 %v76_v18  ;;  %106 = vmatpush.msra.mxu1 %v105_v17  ;;  %v483_v16 = vsub.f32 %v412_v8, %v441_v12 }
  0x14   :  { %108 = vmatmul.f32.vlgmr.msra.gmra.mxu1 %v72_v6  ;;  %310 = vmatpush.msra.mxu0 %v268_v22 }
  0x15   :  { %205 = vmatpush.msrb.mxu1 %v68_v3  ;;  %243 = vmatpush.msrb.mxu2 %v242_v27  ;;  %v437_v3 = vand.u32 4294901760, %v414_v1  ;;  %v484_v19 = vand.u32 4294901760, %v483_v16 }
  0x16   :  { %313 = vmatpush.msra.mxu0 %v274_v26  ;;  %278 = vmatpush.msrb.mxu3 %v277_v37 }
  0x17   :  { %207 = vmatpush.msrb.mxu1 %v70_v4  ;;  %245 = vmatpush.msrb.mxu2 %v244_v32  ;;  %v413_v4 = vld [vmem:[%s811_s5 + $0x8] sm:$0xff]  ;;  %v485_v21 = vsub.f32 %v483_v16, %v484_v19 }
  0x18   :  { %316 = vmatpush.msra.mxu0 %v280_v31  ;;  %284 = vmatpush.msrb.mxu3 %v283_v40  ;;  %v439_v7 = vand.u32 4294901760, %v413_v4 }
  0x19   :  { %339 = vmatpush.msra.mxu1 %v238_v20  ;;  %368 = vmatpush.msra.mxu2 %v269_v25  ;;  %v486_v22 = vand.u32 4294901760, %v485_v21 }
  0x1a   :  { %319 = vmatpush.msra.mxu0 %v286_v36  ;;  %290 = vmatpush.msrb.mxu3 %v289_v42  ;;  %v477_v11 = vsub.f32 %v413_v4, %v439_v7 }
  0x1b   :  { %186 = vmatmul.f32.vlgmr.msrb.gmra.mxu0 %v72_v6  ;;  %341 = vmatpush.msra.mxu1 %v240_v23 }
  0x1c   :  { %209 = vmatmul.f32.vlgmr.msrb.gmra.mxu1 %v72_v6  ;;  %372 = vmatpush.msra.mxu2 %v275_v30  ;;  %v471_v6 = vsub.f32 %v414_v1, %v437_v3  ;;  %v478_v15 = vand.u32 4294901760, %v477_v11 }
  0x1d   :  { %343 = vmatpush.msra.mxu1 %v242_v27  ;;  %399 = vmatpush.msra.mxu3 %v238_v20 }
  0x1e   :  { %376 = vmatpush.msra.mxu2 %v281_v35  ;;  %436 = vmatpush.msrb.mxu0 %v435_v0  ;;  %v472_v10 = vand.u32 4294901760, %v471_v6  ;;  %v479_v18 = vsub.f32 %v477_v11, %v478_v15 }
  0x1f   :  { %345 = vmatpush.msra.mxu1 %v244_v32  ;;  %401 = vmatpush.msra.mxu3 %v240_v23  ;;  %v657_v23 = vld [vmem:[%s810_s4] ss:$0 sm:$0xff] }
  0x20   :  { %380 = vmatpush.msra.mxu2 %v287_v39  ;;  %438 = vmatpush.msrb.mxu0 %v437_v3  ;;  %v473_v14 = vsub.f32 %v471_v6, %v472_v10  ;;  %v480_v20 = vand.u32 4294901760, %v479_v18 }
  0x21   :  { %403 = vmatpush.msra.mxu3 %v242_v27  ;;  %469 = vmatpush.msrb.mxu1 %v468_v13 }
  0x22   :  { %440 = vmatpush.msrb.mxu0 %v439_v7  ;;  %v474_v17 = vand.u32 4294901760, %v473_v14 }
  0x23   :  { %405 = vmatpush.msra.mxu3 %v244_v32 }
  0x24   :  { %442 = vmatpush.msrb.mxu0 %v441_v12  ;;  %475 = vmatpush.msrb.mxu1 %v474_v17 }
  0x26   :  { %481 = vmatpush.msrb.mxu1 %v480_v20 }
  0x28   :  { %487 = vmatpush.msrb.mxu1 %v486_v22 }
  0x90   :  { %v78_v44 = vpop.f32.mrf.mxu0 }
  0x91   :  { %v79_v45 = vadd.f32 %v656_v43, %v78_v44  ;;  %v109_v46 = vpop.f32.mrf.mxu1  ;;  %v135_v47 = vpop.f32.mrf.mxu2  ;;  %v658_v43 = vld [vmem:[%s812_s6] ss:$0 sm:$0xff]  ;;  %s718_s6 = smov [#allocation5]  }
  0x92   :  { %v160_v49 = vpop.f32.mrf.mxu3  ;;  %s640_s26 = sshll.u32 %s718_s6, 4  ;;  %s641_s26 = int_to_ptr.vmem [resolvable:$true] %s640_s26 }
  0x93   :  { %v110_v48 = vadd.f32 %v109_v46, %v79_v45 }
  0x95   :  { %v136_v50 = vadd.f32 %v135_v47, %v110_v48 }
  0x97   :  { %v161_v51 = vadd.f32 %v160_v49, %v136_v50 }
  0x98   :  { %v187_v52 = vpop.f32.mrf.mxu0 }
  0x99   :  { %v188_v53 = vadd.f32 %v187_v52, %v161_v51  ;;  %v210_v54 = vpop.f32.mrf.mxu1 }
  0x9b   :  { %v211_v55 = vadd.f32 %v210_v54, %v188_v53 }
  0x9d   :  { %v213_v56 = vmax.f32 %v211_v55, 0.0 }
  0x9f   :  { %v224_v57 = vsel %vm222_vm1, %v213_v56, 0 }
  0xa0   :  { %v246_v58 = vand.u32 4294901760, %v224_v57 }
  0xa2   :  { %v247_v59 = vsub.f32 %v224_v57, %v246_v58  ;;  %292 = vmatmul.f32.vlgmr.msrb.gmra.mxu3 %v246_v58 }
  0xa3   :  { %536 = vmatpush.msrb.mxu3 %v435_v0 }
  0xa4   :  { %322 = vmatmul.f32.vlgmr.msra.gmra.mxu0 %v247_v59  ;;  %v248_v60 = vand.u32 4294901760, %v247_v59 }
  0xa5   :  { %538 = vmatpush.msrb.mxu3 %v437_v3  ;;  %565 = vmatpush.msra.mxu0 %v466_v5 }
  0xa6   :  { %349 = vmatmul.f32.vlgmr.msra.gmra.mxu1 %v248_v60  ;;  %v249_v61 = vsub.f32 %v247_v59, %v248_v60 }
  0xa7   :  { %540 = vmatpush.msrb.mxu3 %v439_v7  ;;  %569 = vmatpush.msra.mxu0 %v472_v10 }
  0xa8   :  { %v250_v62 = vand.u32 4294901760, %v249_v61  ;;  %596 = vmatpush.msra.mxu1 %v435_v0 }
  0xa9   :  { %542 = vmatpush.msrb.mxu3 %v441_v12  ;;  %573 = vmatpush.msra.mxu0 %v478_v15 }
  0xaa   :  { %251 = vmatmul.f32.vlgmr.msrb.gmra.mxu2 %v250_v62  ;;  %407 = vmatmul.f32.vlgmr.msra.gmra.mxu3 %v246_v58 }
  0xab   :  { %507 = vmatpush.msrb.mxu2 %v465_v2  ;;  %577 = vmatpush.msra.mxu0 %v484_v19 }
  0xac   :  { %598 = vmatpush.msra.mxu1 %v437_v3 }
  0xad   :  { %510 = vmatpush.msrb.mxu2 %v471_v6 }
  0xae   :  { %600 = vmatpush.msra.mxu1 %v439_v7 }
  0xaf   :  { %513 = vmatpush.msrb.mxu2 %v477_v11 }
  0xb0   :  { %602 = vmatpush.msra.mxu1 %v441_v12 }
  0xb1   :  { %516 = vmatpush.msrb.mxu2 %v483_v16 }
  0xb2   :  { %382 = vmatmul.f32.vlgmr.msra.gmra.mxu2 %v246_v58 }
 0x121   :  { %v323_v28 = vpop.f32.mrf.mxu0 }
 0x123   :  { %v350_v30 = vpop.f32.mrf.mxu1 }
 0x125   :  { %v293_v24 = vpop.f32.mrf.mxu3 }
 0x12d   :  { %v252_v25 = vpop.f32.mrf.mxu2  ;;  %v408_v34 = vpop.f32.mrf.mxu3 }
 0x12e   :  { %v253_v26 = vadd.f32 %v657_v23, %v252_v25 }
 0x130   :  { %v294_v27 = vadd.f32 %v293_v24, %v253_v26 }
 0x132   :  { %v324_v29 = vadd.f32 %v323_v28, %v294_v27 }
 0x134   :  { %v351_v31 = vadd.f32 %v350_v30, %v324_v29 }
 0x135   :  { %v383_v32 = vpop.f32.mrf.mxu2 }
 0x136   :  { %v384_v33 = vadd.f32 %v383_v32, %v351_v31 }
 0x138   :  { %v409_v35 = vadd.f32 %v408_v34, %v384_v33 }
 0x13a   :  { %v411_v36 = vmax.f32 %v409_v35, 0.0 }
 0x13c   :  { %v421_v37 = vsel %vm222_vm1, %v411_v36, 0 }
 0x13d   :  { %v443_v38 = vand.u32 4294901760, %v421_v37 }
 0x13f   :  { %v444_v39 = vsub.f32 %v421_v37, %v443_v38  ;;  %489 = vmatmul.f32.vlgmr.msrb.gmra.mxu1 %v443_v38 }
 0x141   :  { %519 = vmatmul.f32.vlgmr.msrb.gmra.mxu2 %v444_v39  ;;  %v445_v40 = vand.u32 4294901760, %v444_v39 }
 0x143   :  { %546 = vmatmul.f32.vlgmr.msrb.gmra.mxu3 %v445_v40  ;;  %v446_v41 = vsub.f32 %v444_v39, %v445_v40 }
 0x145   :  { %v447_v42 = vand.u32 4294901760, %v446_v41 }
 0x147   :  { %448 = vmatmul.f32.vlgmr.msrb.gmra.mxu0 %v447_v42  ;;  %604 = vmatmul.f32.vlgmr.msra.gmra.mxu1 %v443_v38 }
 0x14f   :  { %579 = vmatmul.f32.vlgmr.msra.gmra.mxu0 %v443_v38 }
 0x1bc   :  { %v490_v44 = vpop.f32.mrf.mxu1 }
 0x1c4   :  { %v449_v45 = vpop.f32.mrf.mxu0  ;;  %v520_v48 = vpop.f32.mrf.mxu2 }
 0x1c5   :  { %v450_v46 = vadd.f32 %v658_v43, %v449_v45  ;;  %v605_v54 = vpop.f32.mrf.mxu1 }
 0x1c6   :  { %v547_v50 = vpop.f32.mrf.mxu3 }
 0x1c7   :  { %v491_v47 = vadd.f32 %v490_v44, %v450_v46 }
 0x1c9   :  { %v521_v49 = vadd.f32 %v520_v48, %v491_v47 }
 0x1cb   :  { %v548_v51 = vadd.f32 %v547_v50, %v521_v49 }
 0x1cc   :  { %v580_v52 = vpop.f32.mrf.mxu0 }
 0x1cd   :  { %v581_v53 = vadd.f32 %v580_v52, %v548_v51 }
 0x1cf   :  { %v606_v55 = vadd.f32 %v605_v54, %v581_v53 }
 0x1d1   :  { %v608_v56 = vmul.f32 16.666666, %v606_v55 }
 0x1d3   :  { %v610_v57 = vsel %vm609_vm2, %v608_v56, -inf }
 0x1d4   :  { %611 = vmax.xlane.f32.xlu0 %v610_v57 }
 0x247   :  { %v612_v58 = vpop.xlane.xlu0 %611 }
 0x248   :  { %v613_v59 = vsub.f32 %v608_v56, %v612_v58 }
 0x24a   :  { %v614_v60 = vmul.f32 1.442695, %v613_v59 }
 0x24c   :  { %659 = vpow2.f32 %v614_v60 }
 0x252   :  { %v660_v61 = vpop.eup %659 }
 0x253   :  { %v616_v62 = vsel %vm609_vm2, %v660_v61, 0.0 }
 0x254   :  { %617 = vadd.xlane.f32.xlu0 %v616_v62 }
 0x2c7   :  { %v618_v63 = vpop.xlane.xlu0 %617 }
 0x2c8   :  { %661 = vrcp.f32 %v618_v63  ;;  %v630_v3 = vand.u32 2147483648, %v618_v63  ;;  %v628_v5 = vand.u32 2147483647, %v618_v63  ;;  %vm624_vm4 = vweird.f32 %v618_v63 }
 0x2ca   :  { %v631_v7 = vor.u32 1.1754944e-38, %v630_v3  ;;  %vm629_vm6 = vcmp.eq.f32.partialorder %v628_v5, 8.507059e+37 }
 0x2ce   :  { %v662_v0 = vpop.eup %661 }
 0x2cf   :  { %v620_v1 = vmul.f32 %v662_v0, %v618_v63  ;;  %vm625_vm3 = vweird.f32 %v662_v0 }
 0x2d0   :  { %vm626_vm5 = vmor %vm624_vm4, %vm625_vm3 }
 0x2d1   :  { %v621_v2 = vsub.f32 1.0, %v620_v1 }
 0x2d3   :  { %v622_v4 = vmul.f32 %v662_v0, %v621_v2 }
 0x2d5   :  { %v623_v6 = vadd.f32 %v662_v0, %v622_v4 }
 0x2d7   :  { %v627_v8 = vsel %vm626_vm5, %v662_v0, %v623_v6 }
 0x2d8   :  { %v632_v9 = vsel %vm629_vm6, %v631_v7, %v627_v8 }
 0x2d9   :  { %v633_v10 = vmul.f32 %v660_v61, %v632_v9 }
 0x2db   :  { %634 = vst.msk [vmem:[#allocation5] sm:$0xff] %vm609_vm2, %v633_v10 }
 0x2dc   :  { %645 = dma.vmem_to_hbm [thread:$0]  %s641_s26, 128, %s643_s29, [#allocation4]  }
 0x2dd   :  { %713 = dma.done.wait [#allocation4], 128  }
 0x2de   :  { %714 = vsyncadd [#allocation4], 4294967168 }
 0x2df   :  { %650 = vsyncpa [#allocation3], 1 }
 0x2e0   :  { %651 = vsyncpa [#allocation4], 1 }

</bundles_post_ra>
